<compile_context>
chip_gen: v7x
topology: tpu7x:2x2x1
jax: 0.10.0
libtpu: 0.0.40
codegen_flags: <defaults>
</compile_context>

<pallas_src>
import math

import jax
import jax.numpy as jnp
from jax.experimental import pallas as pl
from jax.experimental.pallas import tpu as pltpu

_LANE = 128
_TARGET_ROWS = 1024   # rows of 128 lanes per grid step (~512 KiB f32 per input block)


def _bce_dice_kernel(x_ref, t_ref, bce_ref, sums_ref):
    """Processes one (G, 8, 128) tile of one sample.

    bce_ref : (8, 128)    resident across the whole grid: elementwise BCE partial sums.
    sums_ref: (3, 8, 128) resident across the inner (tile) axis: per-sample
              [sum(x*t), sum(x), sum(t)] partials for the Dice term.
    """
    b = pl.program_id(0)
    j = pl.program_id(1)

    @pl.when((b == 0) & (j == 0))
    def _():
        bce_ref[...] = jnp.zeros_like(bce_ref)

    @pl.when(j == 0)
    def _():
        sums_ref[...] = jnp.zeros_like(sums_ref)

    x = x_ref[...].astype(jnp.float32)   # (G, 8, 128)
    t = t_ref[...].astype(jnp.float32)

    # Stable BCE-with-logits, elementwise (matches F.binary_cross_entropy_with_logits).
    loss = jnp.maximum(x, 0.0) - x * t + jnp.log(1.0 + jnp.exp(-jnp.abs(x)))

    # Reduce only over the leading vreg-group axis: cheap VPU adds, result stays (8,128).
    bce_ref[...] += jnp.sum(loss, axis=0)
    sums_ref[0] += jnp.sum(x * t, axis=0)
    sums_ref[1] += jnp.sum(x, axis=0)
    sums_ref[2] += jnp.sum(t, axis=0)


def bce_dice_loss_pallas(inputs, targets, smooth=1e-5):
    """0.5 * BCEWithLogits(mean) + (1 - mean_b dice_b), fused in one streaming pass."""
    B = inputs.shape[0]
    x = inputs.reshape(B, -1)
    t = targets.reshape(B, -1)
    n = x.shape[1]                                 # elements per sample

    # Rows of 128 lanes per sample; each grid step sees rows_per_tile of them.
    rows = -(-n // _LANE)
    rows_per_tile = max(8, (min(_TARGET_ROWS, rows) // 8) * 8)
    n_tiles = -(-rows // rows_per_tile)
    rows_pad = n_tiles * rows_per_tile
    pad = rows_pad * _LANE - n

    if pad:
        # Single fused zero-pad per array (skipped when shapes already align).
        x = jnp.pad(x, ((0, 0), (0, pad)))
        t = jnp.pad(t, ((0, 0), (0, pad)))

    g = rows_per_tile // 8
    x4 = x.reshape(B, rows_pad // 8, 8, _LANE)
    t4 = t.reshape(B, rows_pad // 8, 8, _LANE)

    in_spec = pl.BlockSpec((None, g, 8, _LANE), lambda b, j: (b, j, 0, 0))

    bce_slab, sums_slab = pl.pallas_call(
        _bce_dice_kernel,
        out_shape=(
            jax.ShapeDtypeStruct((8, _LANE), jnp.float32),
            jax.ShapeDtypeStruct((B, 3, 8, _LANE), jnp.float32),
        ),
        grid_spec=pltpu.PrefetchScalarGridSpec(
            num_scalar_prefetch=0,
            grid=(B, n_tiles),
            in_specs=[in_spec, in_spec],
            out_specs=(
                pl.BlockSpec((8, _LANE), lambda b, j: (0, 0)),
                pl.BlockSpec((None, 3, 8, _LANE), lambda b, j: (b, 0, 0, 0)),
            ),
        ),
        compiler_params=pltpu.CompilerParams(
            dimension_semantics=("arbitrary", "arbitrary")),
        # TODO(synk): on v7x, shard the batch axis across the two TensorCores with
        # per-core BCE partial blocks instead of a single resident accumulator.
    )(x4, t4)

    # --- BCE term: each padded (x=0, t=0) element contributed exactly log(2).
    bce_sum = jnp.sum(bce_slab)
    if pad:
        bce_sum = bce_sum - jnp.float32(B * pad * math.log(2.0))
    bce = bce_sum / jnp.float32(B * n)

    # --- Dice term (no sigmoid, exactly as in the reference module); padding adds 0.
    sums = jnp.sum(sums_slab, axis=(-2, -1))       # (B, 3) = [sum(x*t), sum(x), sum(t)]
    inter, x_sum, t_sum = sums[:, 0], sums[:, 1], sums[:, 2]
    dice = (2.0 * inter + smooth) / (x_sum + t_sum + smooth)
    dice_loss = 1.0 - jnp.sum(dice) / jnp.float32(B)

    return 0.5 * bce + dice_loss


def _reference(inputs, targets, smooth=1e-5):
    """Pure-JAX mirror of the PyTorch BCEDiceLoss.forward."""
    x = inputs.astype(jnp.float32)
    t = targets.astype(jnp.float32)
    bce = jnp.mean(jnp.maximum(x, 0.0) - x * t + jnp.log(1.0 + jnp.exp(-jnp.abs(x))))
    B = x.shape[0]
    xf = x.reshape(B, -1)
    tf = t.reshape(B, -1)
    inter = jnp.sum(xf * tf, axis=1)
    dice = (2.0 * inter + smooth) / (jnp.sum(xf, axis=1) + jnp.sum(tf, axis=1) + smooth)
    dice_loss = 1.0 - jnp.sum(dice) / B
    return 0.5 * bce + dice_loss


if __name__ == "__main__":
    key = jax.random.PRNGKey(0)
    k1, k2 = jax.random.split(key)
    # NCHW logits and binary targets at small shapes.
    inputs = jax.random.normal(k1, (2, 4, 16, 16), dtype=jnp.float32) * 3.0
    targets = (jax.random.uniform(k2, (2, 4, 16, 16)) > 0.5).astype(jnp.float32)

    loss = bce_dice_loss_pallas(inputs, targets)
    loss = jax.block_until_ready(loss)

    ref = _reference(inputs, targets)
    # f32 summation-order tolerance.
    assert jnp.allclose(loss, ref, rtol=1e-4, atol=1e-4), (loss, ref)
    print("KERNEL_OK")
</pallas_src>

<mosaic_0001>
module attributes {stable_mosaic.version = 11 : i64} {
  func.func @_bce_dice_kernel(%arg0: i32, %arg1: i32, %arg2: memref<1x1x8x128xf32, #tpu.memory_space<vmem>>, %arg3: memref<1x1x8x128xf32, #tpu.memory_space<vmem>>, %arg4: memref<8x128xf32, #tpu.memory_space<vmem>>, %arg5: memref<1x3x8x128xf32, #tpu.memory_space<vmem>>) attributes {dimension_semantics = [#tpu.dimension_semantics<arbitrary>, #tpu.dimension_semantics<arbitrary>], iteration_bounds = array<i64: 2, 1>, scalar_prefetch = 0 : i64, scratch_operands = 0 : i64, tpu.core_type = #tpu.core_type<tc>, window_params = [{transform_indices = @transform_0, window_bounds = array<i64: 1, 1, 8, 128>}, {transform_indices = @transform_1, window_bounds = array<i64: 1, 1, 8, 128>}, {pipeline_mode = #tpu.pipeline_mode<synchronous>, transform_indices = @transform_2, window_bounds = array<i64: 8, 128>}, {transform_indices = @transform_3, window_bounds = array<i64: 1, 3, 8, 128>}]} {
    %c0_i32 = arith.constant 0 : i32
    %0 = arith.cmpi eq, %arg0, %c0_i32 : i32
    %c0_i32_0 = arith.constant 0 : i32
    %1 = arith.cmpi eq, %arg1, %c0_i32_0 : i32
    %2 = arith.andi %0, %1 : i1
    %3 = arith.extui %2 : i1 to i32
    %c0_i32_1 = arith.constant 0 : i32
    %4 = arith.cmpi ne, %3, %c0_i32_1 : i32
    scf.if %4 {
      %cst_43 = arith.constant 0.000000e+00 : f32
      %50 = vector.broadcast %cst_43 : f32 to vector<8x128xf32>
      %c0_44 = arith.constant 0 : index
      %c0_45 = arith.constant 0 : index
      %51 = vector.load %arg4[%c0_44, %c0_45] : memref<8x128xf32, #tpu.memory_space<vmem>>, vector<8x128xf32>
      tpu.vector_store %arg4[%c0_44, %c0_45], %50 {strides = array<i32>} : memref<8x128xf32, #tpu.memory_space<vmem>>, vector<8x128xf32>,
    } else {
    }
    %c0_i32_2 = arith.constant 0 : i32
    %5 = arith.cmpi eq, %arg1, %c0_i32_2 : i32
    %6 = arith.extui %5 : i1 to i32
    %c0_i32_3 = arith.constant 0 : i32
    %7 = arith.cmpi ne, %6, %c0_i32_3 : i32
    scf.if %7 {
      %cst_43 = arith.constant 0.000000e+00 : f32
      %50 = vector.broadcast %cst_43 : f32 to vector<3x8x128xf32>
      %c0_44 = arith.constant 0 : index
      %c0_45 = arith.constant 0 : index
      %c0_46 = arith.constant 0 : index
      %c0_47 = arith.constant 0 : index
      %51 = vector.load %arg5[%c0_44, %c0_45, %c0_46, %c0_47] : memref<1x3x8x128xf32, #tpu.memory_space<vmem>>, vector<1x3x8x128xf32>
      %52 = vector.shape_cast %51 : vector<1x3x8x128xf32> to vector<3x8x128xf32>
      %53 = vector.shape_cast %50 : vector<3x8x128xf32> to vector<1x3x8x128xf32>
      tpu.vector_store %arg5[%c0_44, %c0_45, %c0_46, %c0_47], %53 {strides = array<i32>} : memref<1x3x8x128xf32, #tpu.memory_space<vmem>>, vector<1x3x8x128xf32>,
    } else {
    }
    %c0 = arith.constant 0 : index
    %c0_4 = arith.constant 0 : index
    %c0_5 = arith.constant 0 : index
    %c0_6 = arith.constant 0 : index
    %8 = vector.load %arg2[%c0, %c0_4, %c0_5, %c0_6] : memref<1x1x8x128xf32, #tpu.memory_space<vmem>>, vector<1x1x8x128xf32>
    %9 = vector.shape_cast %8 : vector<1x1x8x128xf32> to vector<1x8x128xf32>
    %c0_7 = arith.constant 0 : index
    %c0_8 = arith.constant 0 : index
    %c0_9 = arith.constant 0 : index
    %c0_10 = arith.constant 0 : index
    %10 = vector.load %arg3[%c0_7, %c0_8, %c0_9, %c0_10] : memref<1x1x8x128xf32, #tpu.memory_space<vmem>>, vector<1x1x8x128xf32>
    %11 = vector.shape_cast %10 : vector<1x1x8x128xf32> to vector<1x8x128xf32>
    %cst = arith.constant 0.000000e+00 : f32
    %12 = vector.broadcast %cst : f32 to vector<1x8x128xf32>
    %13 = arith.maximumf %9, %12 : vector<1x8x128xf32>
    %14 = arith.mulf %9, %11 : vector<1x8x128xf32>
    %15 = arith.subf %13, %14 : vector<1x8x128xf32>
    %16 = math.absf %9 : vector<1x8x128xf32>
    %cst_11 = arith.constant 0.000000e+00 : f32
    %17 = vector.broadcast %cst_11 : f32 to vector<1x8x128xf32>
    %18 = arith.subf %17, %16 : vector<1x8x128xf32>
    %19 = math.exp %18 : vector<1x8x128xf32>
    %cst_12 = arith.constant 1.000000e+00 : f32
    %20 = vector.broadcast %cst_12 : f32 to vector<1x8x128xf32>
    %21 = arith.addf %20, %19 : vector<1x8x128xf32>
    %22 = math.log %21 : vector<1x8x128xf32>
    %23 = arith.addf %15, %22 : vector<1x8x128xf32>
    %c0_13 = arith.constant 0 : index
    %c0_14 = arith.constant 0 : index
    %24 = vector.load %arg4[%c0_13, %c0_14] : memref<8x128xf32, #tpu.memory_space<vmem>>, vector<8x128xf32>
    %cst_15 = arith.constant dense<0.000000e+00> : vector<8x128xf32>
    %25 = vector.multi_reduction <add>, %23, %cst_15 [0] : vector<1x8x128xf32> to vector<8x128xf32>
    %26 = arith.addf %24, %25 : vector<8x128xf32>
    %c0_16 = arith.constant 0 : index
    %c0_17 = arith.constant 0 : index
    %27 = vector.load %arg4[%c0_16, %c0_17] : memref<8x128xf32, #tpu.memory_space<vmem>>, vector<8x128xf32>
    tpu.vector_store %arg4[%c0_16, %c0_17], %26 {strides = array<i32>} : memref<8x128xf32, #tpu.memory_space<vmem>>, vector<8x128xf32>,
    %c0_18 = arith.constant 0 : index
    %c0_19 = arith.constant 0 : index
    %c0_20 = arith.constant 0 : index
    %c0_21 = arith.constant 0 : index
    %28 = vector.load %arg5[%c0_18, %c0_19, %c0_20, %c0_21] : memref<1x3x8x128xf32, #tpu.memory_space<vmem>>, vector<1x1x8x128xf32>
    %29 = vector.shape_cast %28 : vector<1x1x8x128xf32> to vector<8x128xf32>
    %30 = arith.mulf %9, %11 : vector<1x8x128xf32>
    %cst_22 = arith.constant dense<0.000000e+00> : vector<8x128xf32>
    %31 = vector.multi_reduction <add>, %30, %cst_22 [0] : vector<1x8x128xf32> to vector<8x128xf32>
    %32 = arith.addf %29, %31 : vector<8x128xf32>
    %c0_23 = arith.constant 0 : index
    %c0_24 = arith.constant 0 : index
    %c0_25 = arith.constant 0 : index
    %c0_26 = arith.constant 0 : index
    %33 = vector.load %arg5[%c0_23, %c0_24, %c0_25, %c0_26] : memref<1x3x8x128xf32, #tpu.memory_space<vmem>>, vector<1x1x8x128xf32>
    %34 = vector.shape_cast %33 : vector<1x1x8x128xf32> to vector<8x128xf32>
    %35 = vector.shape_cast %32 : vector<8x128xf32> to vector<1x1x8x128xf32>
    tpu.vector_store %arg5[%c0_23, %c0_24, %c0_25, %c0_26], %35 {strides = array<i32>} : memref<1x3x8x128xf32, #tpu.memory_space<vmem>>, vector<1x1x8x128xf32>,
    %c0_27 = arith.constant 0 : index
    %c1 = arith.constant 1 : index
    %c0_28 = arith.constant 0 : index
    %c0_29 = arith.constant 0 : index
    %36 = vector.load %arg5[%c0_27, %c1, %c0_28, %c0_29] : memref<1x3x8x128xf32, #tpu.memory_space<vmem>>, vector<1x1x8x128xf32>
    %37 = vector.shape_cast %36 : vector<1x1x8x128xf32> to vector<8x128xf32>
    %cst_30 = arith.constant dense<0.000000e+00> : vector<8x128xf32>
    %38 = vector.multi_reduction <add>, %9, %cst_30 [0] : vector<1x8x128xf32> to vector<8x128xf32>
    %39 = arith.addf %37, %38 : vector<8x128xf32>
    %c0_31 = arith.constant 0 : index
    %c1_32 = arith.constant 1 : index
    %c0_33 = arith.constant 0 : index
    %c0_34 = arith.constant 0 : index
    %40 = vector.load %arg5[%c0_31, %c1_32, %c0_33, %c0_34] : memref<1x3x8x128xf32, #tpu.memory_space<vmem>>, vector<1x1x8x128xf32>
    %41 = vector.shape_cast %40 : vector<1x1x8x128xf32> to vector<8x128xf32>
    %42 = vector.shape_cast %39 : vector<8x128xf32> to vector<1x1x8x128xf32>
    tpu.vector_store %arg5[%c0_31, %c1_32, %c0_33, %c0_34], %42 {strides = array<i32>} : memref<1x3x8x128xf32, #tpu.memory_space<vmem>>, vector<1x1x8x128xf32>,
    %c0_35 = arith.constant 0 : index
    %c2 = arith.constant 2 : index
    %c0_36 = arith.constant 0 : index
    %c0_37 = arith.constant 0 : index
    %43 = vector.load %arg5[%c0_35, %c2, %c0_36, %c0_37] : memref<1x3x8x128xf32, #tpu.memory_space<vmem>>, vector<1x1x8x128xf32>
    %44 = vector.shape_cast %43 : vector<1x1x8x128xf32> to vector<8x128xf32>
    %cst_38 = arith.constant dense<0.000000e+00> : vector<8x128xf32>
    %45 = vector.multi_reduction <add>, %11, %cst_38 [0] : vector<1x8x128xf32> to vector<8x128xf32>
    %46 = arith.addf %44, %45 : vector<8x128xf32>
    %c0_39 = arith.constant 0 : index
    %c2_40 = arith.constant 2 : index
    %c0_41 = arith.constant 0 : index
    %c0_42 = arith.constant 0 : index
    %47 = vector.load %arg5[%c0_39, %c2_40, %c0_41, %c0_42] : memref<1x3x8x128xf32, #tpu.memory_space<vmem>>, vector<1x1x8x128xf32>
    %48 = vector.shape_cast %47 : vector<1x1x8x128xf32> to vector<8x128xf32>
    %49 = vector.shape_cast %46 : vector<8x128xf32> to vector<1x1x8x128xf32>
    tpu.vector_store %arg5[%c0_39, %c2_40, %c0_41, %c0_42], %49 {strides = array<i32>} : memref<1x3x8x128xf32, #tpu.memory_space<vmem>>, vector<1x1x8x128xf32>,
    return
  }
  func.func @transform_0(%arg0: i32, %arg1: i32) -> (i32, i32, i32, i32) {
    %c0_i32 = arith.constant 0 : i32
    %c0_i32_0 = arith.constant 0 : i32
    %c0_i32_1 = arith.constant 0 : i32
    return %arg0, %arg1, %c0_i32, %c0_i32_0 : i32, i32, i32, i32
  }
  func.func @transform_1(%arg0: i32, %arg1: i32) -> (i32, i32, i32, i32) {
    %c0_i32 = arith.constant 0 : i32
    %c0_i32_0 = arith.constant 0 : i32
    %c0_i32_1 = arith.constant 0 : i32
    return %arg0, %arg1, %c0_i32, %c0_i32_0 : i32, i32, i32, i32
  }
  func.func @transform_2(%arg0: i32, %arg1: i32) -> (i32, i32) {
    %c0_i32 = arith.constant 0 : i32
    %c0_i32_0 = arith.constant 0 : i32
    %c0_i32_1 = arith.constant 0 : i32
    return %c0_i32, %c0_i32_0 : i32, i32
  }
  func.func @transform_3(%arg0: i32, %arg1: i32) -> (i32, i32, i32, i32) {
    %c0_i32 = arith.constant 0 : i32
    %c0_i32_0 = arith.constant 0 : i32
    %c0_i32_1 = arith.constant 0 : i32
    %c0_i32_2 = arith.constant 0 : i32
    return %arg0, %c0_i32, %c0_i32_0, %c0_i32_1 : i32, i32, i32, i32
  }
}

</mosaic_0001>

<bundles_post_ra>
// kernel: tpu_custom_call.1
= control target key start
LH: loop header
LB: loop body
LE: loop exit
PB: predicated region body
PF: predicated region fallthrough
CT: control target
= control target key end

     0   :  { %9 = vsyncpa [#allocation3], 0  ;;  %s991_s0 = inlined_call_operand.hbm [shape: f32[2,1,8,128], index: 0, kind: input, shape index: {}]   ;;  %s992_s1 = inlined_call_operand.hbm [shape: f32[2,1,8,128], index: 1, kind: input, shape index: {}]   ;;  %s993_s2 = inlined_call_operand.hbm [shape: f32[8,128], index: 2, kind: output, shape index: {0}]   ;;  %s994_s3 = inlined_call_operand.hbm [shape: f32[2,3,8,128], index: 3, kind: output, shape index: {1}]  }
   0x1   :  { %11 = vsyncpa [#allocation3 + $0x1], 0 }
   0x2   :  { %12 = vsyncpa [#allocation6], 0 }
   0x3   :  { %14 = vsyncpa [#allocation6 + $0x1], 0 }
   0x4   :  { %15 = vsyncpa [#allocation4], 0 }
   0x5   :  { %16 = vsyncpa [#allocation9], 0 }
   0x6   :  { %18 = vsyncpa [#allocation9 + $0x1], 0  ;;  %s739_s12 = smov 0   ;;  %s741_s13 = smov 0  }
   0x7   :  { %s743_s14 = smov 0   ;;  %s745_s15 = smov 0  }
   0x8   :  { %s747_s16 = smov 0   ;;  %s749_s17 = smov 0  }
   0x9 LB: > { %s428_s18 = sadd.s32 4294967295, %s710_s17   ;;  %s429_s19 = sadd.s32 4294967294, %s710_s17   ;;  %s710_s17 = sphi %s749_s17, %s24_s17   ;;  %s706_s16 = sphi %s747_s16, %s1018_s16   ;;  %s702_s15 = sphi %s745_s15, %s1017_s15   ;;  %s698_s14 = sphi %s743_s14, %s1016_s14   ;;  %s694_s13 = sphi %s741_s13, %s1015_s13   ;;  %s690_s12 = sphi %s739_s12, %s1014_s12  }
   0xa   : > { %s36_s20 = sadd.s32 1, %s706_s16  ;;  %s45_s21 = sadd.s32 1, %s698_s14 }
   0xb   : > { %p38_p0 = scmp.ge.s32.totalorder %s36_s20, 2  ;;  %p52_p1 = scmp.ne.s32.totalorder %s698_s14, %s694_s13 }
   0xc   : > { %p53_p2 = scmp.eq.s32.totalorder %s710_s17, 0  ;;  %p58_p3 = scmp.ne.s32.totalorder %s694_s13, %s690_s12 }
   0xd   : > { %s1020_s20 = smov (%p38_p0, %s36_s20), 0  ;;  %p59_p5 = scmp.eq.s32.totalorder %s428_s18, 0 }
   0xe   : > { %p780_p4 = por %p53_p2, %p52_p1  ;;  %s40_s23 = ssub.s32 %s706_s16, %s1020_s20 }
   0xf   : > { %p786_p6 = scmp.eq.s32.totalorder %s428_s18, 1  ;;  %p43_p7 = scmp.eq.s32.totalorder %s40_s23, 0 }
  0x10   : > { %p790_p8 = por %p59_p5, %p58_p3  ;;  %p137_p10 = scmp.eq.s32.totalorder %s429_s19, 1 }
  0x11   : > { %s1000_s24 = scalar_select %p786_p6, 1, 0 }
  0x12   : > { %s1001_s25 = scalar_select %p790_p8, 1, 0 }
  0x13   : > { %p796_p9 = por %p786_p6, %p52_p1  ;;  %p803_p11 = por %p137_p10, %p58_p3 }
  0x14   : > { %s801_s27 = scalar_select %p43_p7, %s698_s14, %s45_s21  }
  0x15   : > { %s1002_s26 = scalar_select %p796_p9, 1, 0 }
  0x16   : > { %s1003_s28 = scalar_select %p803_p11, 1, 0 }
  0x17   : > { %p473_p13 = scmp.lt.s32.totalorder %s710_s17, 2  ;;  %s810_s29 = sand.u32 1, %s698_s14  }
  0x18   : > { %s432_s30 = sshll.u32 %s810_s29, 3  ;;  %s433_s4 = sshll.u32 %s706_s16, 7 }
  0x19   : > { %s819_s7 = scalar_lea.hbm %s991_s0, %s433_s4  ;;  %s161_s8 = scalar_lea.vmem [#allocation2], %s432_s30 }
  0x1a   : > { %s169_s9 = sshll.u32 %s161_s8, 4  ;;  %p827_p0 = pnand %p473_p13, %p780_p4  ;;  %s823_s9 = int_to_ptr.vmem [resolvable:$true] %s169_s9 }
  0x1b   : > { %s158_s11 = scalar_lea.sflag [#allocation3], %s810_s29  ;;  %s534_s18 = scalar_lea.hbm %s819_s7, 128 }
  0x1c   : > { %p535_p3 = scmp.ne.s32.totalorder %s819_s7, %s534_s18  ;;  %p536_p5 = pneg %p827_p0 }
  0x1d   : > { %s539_s22 = scalar_lea.hbm %s991_s0, 256  ;;  %p540_p4 = scmp.lt.u32.totalorder %s819_s7, %s991_s0 }
  0x1e   : > { %p537_p7 = pnand %p536_p5, %p535_p3  ;;  %p541_p13 = scmp.lt.u32.totalorder %s539_s22, %s534_s18 }
  0x1f   : > { %p543_p1 = scmp.lt.u32.totalorder %s534_s18, %s819_s7 }
  0x20   : > { %p538_p10 = pneg %p537_p7  ;;  %p542_p12 = por %p541_p13, %p540_p4 }
  0x22   : > { %p544_p2 = por %p543_p1, %p542_p12 }
  0x24   : > { %p545_p11 = pnand %p544_p2, %p538_p10 }
  0x26   : > { %548 = shalt.err (!%p545_p11)
}
  0x27   : > { %s549_s6 = scalar_lea.vmem %s823_s9, 128  ;;  %s712_s8 = smov [#allocation2]  }
  0x28   : > { %p550_p3 = scmp.ne.s32.totalorder %s823_s9, %s549_s6  ;;  %s554_s19 = sshll.u32 %s712_s8, 4  ;;  %s555_s19 = int_to_ptr.vmem [resolvable:$false] %s554_s19 }
  0x29   : > { %s556_s21 = scalar_lea.vmem %s555_s19, 256  ;;  %p557_p9 = scmp.lt.s32.totalorder %s823_s9, %s555_s19 }
  0x2a   : > { %p552_p7 = pnand %p550_p3, %p536_p5  ;;  %p558_p4 = scmp.lt.s32.totalorder %s556_s21, %s549_s6 }
  0x2c   : > { %p553_p6 = pneg %p552_p7  ;;  %p559_p13 = por %p558_p4, %p557_p9 }
  0x2e   : > { %p560_p12 = pnand %p559_p13, %p553_p6 }
  0x30   : > { %563 = shalt.err (!%p560_p12)
}
  0x31   : > { %465 = dma.hbm_to_vmem [thread:$0]  (!%p827_p0), %s819_s7, 128, %s823_s9, %s158_s11  }
  0x32   : > { %p1005_p11 = scmp.lt.s32.totalorder %s710_s17, 3  ;;  %p1006_p1 = scmp.ge.s32.totalorder %s710_s17, 1 }
  0x33   : > { %s872_s5 = scalar_lea.hbm %s992_s1, %s433_s4  ;;  %s180_s6 = scalar_lea.vmem [#allocation5], %s432_s30 }
  0x34   : > { %p863_p2 = pnand %p1006_p1, %p1005_p11  ;;  %s188_s8 = sshll.u32 %s180_s6, 4  ;;  %s189_s8 = int_to_ptr.vmem [resolvable:$true] %s188_s8 }
  0x35   : > { %s177_s7 = scalar_lea.sflag [#allocation6], %s810_s29  ;;  %s564_s9 = scalar_lea.hbm %s872_s5, 128 }
  0x36   : > { %s1007_s18 = scalar_select %p863_p2, 1, 0 }
  0x37   : > { %p565_p6 = scmp.ne.s32.totalorder %s872_s5, %s564_s9  ;;  %s569_s4 = scalar_lea.hbm %s992_s1, 256 }
  0x38   : > { %p570_p3 = scmp.lt.u32.totalorder %s872_s5, %s992_s1  ;;  %p571_p7 = scmp.lt.u32.totalorder %s569_s4, %s564_s9 }
  0x39   : > { %p567_p9 = pnand %p565_p6, %p536_p5  ;;  %p573_p13 = scmp.lt.u32.totalorder %s564_s9, %s872_s5 }
  0x3a   : > { %p572_p4 = por %p571_p7, %p570_p3 }
  0x3b   : > { %p568_p10 = pneg %p567_p9 }
  0x3c   : > { %p574_p12 = por %p573_p13, %p572_p4 }
  0x3e   : > { %p575_p11 = pnand %p574_p12, %p568_p10 }
  0x40   : > { %578 = shalt.err (!%p575_p11)
}
  0x41   : > { %s579_s29 = scalar_lea.vmem %s189_s8, 128  ;;  %s713_s30 = smov [#allocation5]  }
  0x42   : > { %p580_p1 = scmp.ne.s32.totalorder %s189_s8, %s579_s29  ;;  %s584_s23 = sshll.u32 %s713_s30, 4  ;;  %s585_s23 = int_to_ptr.vmem [resolvable:$false] %s584_s23 }
  0x43   : > { %s586_s6 = scalar_lea.vmem %s585_s23, 256  ;;  %p587_p8 = scmp.lt.s32.totalorder %s189_s8, %s585_s23 }
  0x44   : > { %p582_p6 = pnand %p580_p1, %p536_p5  ;;  %p588_p2 = scmp.lt.s32.totalorder %s586_s6, %s579_s29 }
  0x46   : > { %p583_p9 = pneg %p582_p6  ;;  %p589_p3 = por %p588_p2, %p587_p8 }
  0x48   : > { %p590_p7 = pnand %p589_p3, %p583_p9 }
  0x4a   : > { %593 = shalt.err (!%p590_p7)
}
  0x4b   : > { %468 = dma.hbm_to_vmem [thread:$0]  (!%p827_p0), %s872_s5, 128, %s189_s8, %s177_s7  }
  0x4c   : > { %p1008_p10 = scmp.ne.s32.totalorder %s1007_s18, 0 }
  0x4d   : > { %s899_s9 = sand.u32 (!%p1008_p10), 1, %s694_s13   ;;  %p1009_p5 = scmp.ne.s32.totalorder (!%p1008_p10), %s1001_s25, 0 }
  0x4e   : > { %197 = sbr.rel (%p1008_p10) target bundleno = 166 (0xa6), region = 28  ;;  %s437_s11 = sshll.u32 (!%p1008_p10), %s899_s9, 3 }
  0x4f   : > { %s200_s19 = scalar_lea.sflag (!%p1008_p10), [#allocation3], %s899_s9  ;;  %s203_s4 = scalar_lea.vmem (!%p1008_p10), [#allocation2], %s437_s11 }
  0x55   : > { %673 = dma.done.wait (%p1009_p5), %s200_s19, 128  }
  0x56   : > { %675 = vsyncadd (%p1009_p5), %s200_s19, 4294967168  ;;  %s209_s10 = scalar_lea.sflag [#allocation6], %s899_s9  ;;  %s212_s5 = scalar_lea.vmem [#allocation5], %s437_s11 }
  0x57   : > { %677 = dma.done.wait (%p1009_p5), %s209_s10, 128  }
  0x58   : > { %679 = vsyncadd (%p1009_p5), %s209_s10, 4294967168  ;;  %s450_s18 = smul.u32 24, %s899_s9  ;;  %p240_p8 = scmp.eq.s32.totalorder %s702_s15, 0 }
  0x59   : > { %v714_v0 = vmov (%p240_p8), 0.0  }
  0x5a   : > { %s239_s8 = scalar_lea.vmem [#allocation8], %s450_s18  ;;  %245 = sbr.rel (!%p240_p8) target bundleno = 97 (0x61), region = 40  ;;  %246 = vst [vmem:[#allocation7] sm:$0xff] (%p240_p8), %v714_v0 }
  0x61 PF: > { %v253_v1 = vld [vmem:[%s203_s4] sm:$0xff]  ;;  %v254_v2 = vld [vmem:[%s212_s5] sm:$0xff]  ;;  %s451_s7 = smul.u32 384, %s702_s15  ;;  %s309_s25 = sshll.u32 %s239_s8, 4  ;;  %s920_s25 = int_to_ptr.vmem [resolvable:$true] %s309_s25 }
  0x62   : > { %v256_v3 = vmul.f32 %v254_v2, %v253_v1  ;;  %v258_v4 = vand.u32 2147483647, %v253_v1  ;;  %441 = vst [vmem:[%s239_s8 + $0x8] sm:$0xff] %v253_v1  ;;  %443 = vst [vmem:[%s239_s8 + $0x10] sm:$0xff] %v254_v2  ;;  %s285_s30 = scalar_lea.sflag [#allocation9], %s899_s9  ;;  %s594_s23 = scalar_lea.vmem %s920_s25, 384 }
  0x63   : > { %s918_s29 = scalar_lea.hbm %s994_s3, %s451_s7  ;;  %p595_p0 = scmp.ne.s32.totalorder %s920_s25, %s594_s23 }
  0x64   : > { %v259_v5 = vsub.f32 0.0, %v258_v4  ;;  %273 = vst [vmem:[%s239_s8] sm:$0xff] %v256_v3  ;;  %p1010_p2 = scmp.ne.s32.totalorder %s1002_s26, 0  ;;  %s715_s15 = smov [#allocation8]  }
  0x65   : > { %s598_s6 = sshll.u32 %s715_s15, 4  ;;  %s599_s6 = int_to_ptr.vmem [resolvable:$false] %s598_s6 }
  0x66   : > { %v260_v6 = vmul.f32 1.442695, %v259_v5  ;;  %p596_p4 = pnand %p595_p0, %p1010_p2  ;;  %s600_s11 = scalar_lea.vmem %s599_s6, 768 }
  0x67   : > { %p601_p12 = scmp.lt.s32.totalorder %s920_s25, %s599_s6  ;;  %p602_p11 = scmp.lt.s32.totalorder %s600_s11, %s594_s23 }
  0x68   : > { %p597_p13 = pneg %p596_p4 }
  0x69   : > { %p603_p1 = por %p602_p11, %p601_p12 }
  0x6b   : > { %p604_p6 = pnand %p603_p1, %p597_p13 }
  0x6d   : > { %607 = shalt.err (!%p604_p6)
}
  0x6e   : > { %s608_s19 = scalar_lea.hbm %s918_s29, 384  ;;  %s612_s5 = scalar_lea.hbm %s994_s3, 768 }
  0x6f   : > { %p609_p9 = scmp.ne.s32.totalorder %s918_s29, %s608_s19  ;;  %p613_p10 = scmp.lt.u32.totalorder %s918_s29, %s994_s3 }
  0x70   : > { %p614_p5 = scmp.lt.u32.totalorder %s612_s5, %s608_s19  ;;  %p616_p0 = scmp.lt.u32.totalorder %s608_s19, %s918_s29 }
  0x71   : > { %p610_p3 = pnand %p609_p9, %p1010_p2 }
  0x72   : > { %p615_p8 = por %p614_p5, %p613_p10 }
  0x73   : > { %p611_p7 = pneg %p610_p3 }
  0x74   : > { %p617_p4 = por %p616_p0, %p615_p8 }
  0x76   : > { %p618_p13 = pnand %p617_p4, %p611_p7 }
  0x78   : > { %621 = shalt.err (!%p618_p13)
}
  0x79   : > { %s716_s7 = smov 128   ;;  %s717_s21 = smov 8   ;;  %530 = vpow2.f32 %v260_v6  ;;  %v255_v9 = vmax.f32 %v253_v1, 0.0  ;;  %v266_v13 = vld [vmem:[#allocation7] sm:$0xff] }
  0x7a   : > { %458 = dma.vmem_to_hbm [thread:$0]  (%p1010_p2), %s920_s25, 384, %s918_s29, %s285_s30, %s716_s7, %s716_s7, %s717_s21  }
  0x7b   : > { %v257_v10 = vsub.f32 %v255_v9, %v256_v3  ;;  %s718_s22 = smov [#allocation7]   ;;  %p1011_p11 = scmp.ne.s32.totalorder %s1000_s24, 0 }
  0x7c   : > { %s296_s23 = sshll.u32 %s718_s22, 4  ;;  %s297_s23 = int_to_ptr.vmem [resolvable:$true] %s296_s23 }
  0x7d   : > { %s622_s15 = scalar_lea.vmem %s297_s23, 128  ;;  %p629_p6 = scmp.lt.s32.totalorder %s297_s23, %s297_s23 }
  0x7e   : > { %p623_p12 = scmp.ne.s32.totalorder %s297_s23, %s622_s15  ;;  %p630_p9 = scmp.lt.s32.totalorder %s622_s15, %s622_s15 }
  0x80   : > { %p624_p2 = pnand %p623_p12, %p1011_p11  ;;  %p631_p3 = por %p630_p9, %p629_p6 }
  0x82   : > { %p625_p1 = pneg %p624_p2 }
  0x83   : > { %v531_v7 = vpop.eup %530 }
  0x84   : > { %v262_v8 = vadd.f32 1.0, %v531_v7  ;;  %p632_p7 = pnand %p631_p3, %p625_p1 }
  0x86   : > { %532 = vlog2.f32 %v262_v8 }
  0x90   : > { %v533_v11 = vpop.eup %532 }
  0x91   : > { %v264_v12 = vmul.f32 0.6931472, %v533_v11 }
  0x93   : > { %v265_v14 = vadd.f32 %v264_v12, %v257_v10 }
  0x95   : > { %v268_v15 = vadd.f32 %v266_v13, %v265_v14 }
  0x97   : > { %269 = vst [vmem:[#allocation7] sm:$0xff] %v268_v15 }
  0x98   : > { %635 = shalt.err (!%p632_p7)
}
  0x99   : > { %s636_s25 = scalar_lea.hbm %s993_s2, 128 }
  0x9a   : > { %p637_p10 = scmp.ne.s32.totalorder %s993_s2, %s636_s25  ;;  %p642_p0 = scmp.lt.u32.totalorder %s636_s25, %s993_s2 }
  0x9c   : > { %p638_p5 = pnand %p637_p10, %p1011_p11 }
  0x9e   : > { %p639_p8 = pneg %p638_p5 }
  0xa0   : > { %p644_p4 = pnand %p642_p0, %p639_p8 }
  0xa2   : > { %647 = shalt.err (!%p644_p4)
}
  0xa3   : > { %457 = dma.vmem_to_hbm [thread:$0]  (%p1011_p11), %s297_s23, 128, %s993_s2, [#allocation4]  }
  0xa4   : > { %681 = dma.done.wait (%p1011_p11), [#allocation4], 128  }
  0xa5   : > { %683 = vsyncadd (%p1011_p11), [#allocation4], 4294967168 }
  0xa6 PF: > { %s328_s10 = sand.u32 1, %s690_s12   ;;  %p1012_p13 = scmp.ne.s32.totalorder %s1003_s28, 0 }
  0xa7   : > { %p1013_p12 = scmp.ge.s32.totalorder %s710_s17, 2  ;;  %s329_s5 = scalar_lea.sflag [#allocation9], %s328_s10 }
  0xa9   : > { %p470_p2 = pnand %p1013_p12, %p1012_p13 }
  0xab   : > { %685 = dma.done.wait (!%p470_p2), %s329_s5, 384  }
  0xac   : > { %687 = vsyncadd (!%p470_p2), %s329_s5, 4294966912  ;;  %s24_s17 = sadd.s32 1, %s710_s17   ;;  %s1014_s12 = smov %s694_s13 }
  0xad   : > { %p21_p1 = scmp.ge.s32.totalorder %s24_s17, 4   ;;  %s1015_s13 = smov %s698_s14 }
  0xae   : > { %s1016_s14 = smov %s801_s27  ;;  %s1017_s15 = smov %s706_s16 }
  0xaf   : > { %s1018_s16 = smov %s1020_s20  ;;  %23 = sbr.rel (!%p21_p1) target bundleno = 9 (0x9), region = 105 }
  0xb6   :  { %334 = vsyncpa [#allocation3], 1 }
  0xb7   :  { %336 = vsyncpa [#allocation3 + $0x1], 1 }
  0xb8   :  { %337 = vsyncpa [#allocation6], 1 }
  0xb9   :  { %339 = vsyncpa [#allocation6 + $0x1], 1 }
  0xba   :  { %340 = vsyncpa [#allocation4], 1 }
  0xbb   :  { %342 = vsyncpa [#allocation4 + $0x1], 1 }
  0xbc   :  { %343 = vsyncpa [#allocation9], 1 }
  0xbd   :  { %345 = vsyncpa [#allocation9 + $0x1], 1 }

</bundles_post_ra>
